<compile_context>
chip_gen: v5e
topology: v5e:2x2
jax: 0.10.0
libtpu: 0.0.40
codegen_flags: <defaults>
</compile_context>

<pallas_src>
import jax
import jax.numpy as jnp
from jax import lax
from jax.experimental import pallas as pl
from jax.experimental.pallas import tpu as pltpu


# ----------------------------- Pallas kernel ------------------------------ #

def _ln_elu_layer(x, w, b, g, be):
    """Linear -> LayerNorm(eps=1e-5) -> (Dropout=identity) -> ELU(alpha=1)."""
    h = jnp.dot(x, w, preferred_element_type=jnp.float32) + b
    # Fused-reduction LayerNorm: var = E[h^2] - E[h]^2 (two independent
    # reduces instead of a serial reduce -> subtract -> reduce chain).
    mu = jnp.mean(h, axis=-1, keepdims=True)
    ms = jnp.mean(h * h, axis=-1, keepdims=True)
    hn = (h - mu) * lax.rsqrt(ms - mu * mu + 1e-5)
    hn = hn * g + be
    # ELU, alpha = 1.0 (exp lands on the EUP slot).
    return jnp.where(hn > 0, hn, jnp.exp(hn) - 1.0)


def model0_kernel(counts_ref, table_ref,
                  w1_ref, b1_ref, g1_ref, be1_ref,
                  w2_ref, b2_ref, g2_ref, be2_ref,
                  w3_ref, b3_ref, g3_ref, be3_ref,
                  w4_ref, b4_ref, g4_ref, be4_ref,
                  w5t_ref, b5_ref,
                  out_ref, acc_ref):
    kv = pl.program_id(1)

    @pl.when(kv == 0)
    def _():
        acc_ref[...] = jnp.zeros_like(acc_ref)

    # Embedding gather + sum over the sequence as one MXU matmul (bf16 fast
    # path, f32 accumulation), tiled over the vocabulary axis:
    #   s[b, :] = sum_l table[idx[b, l], :] = counts[b, :] @ table
    acc_ref[...] += jnp.dot(counts_ref[...], table_ref[...],
                            preferred_element_type=jnp.float32)   # (TB, E)

    @pl.when(kv == pl.num_programs(1) - 1)
    def _():
        s = acc_ref[...]                                          # (TB, E) f32

        # cat([sum, mean]) @ W1 folded on the host into w1_eff (mean = sum/L).
        h1 = _ln_elu_layer(s, w1_ref[...], b1_ref[...], g1_ref[...], be1_ref[...])
        h2 = _ln_elu_layer(h1, w2_ref[...], b2_ref[...], g2_ref[...], be2_ref[...])
        h3 = _ln_elu_layer(h2, w3_ref[...], b3_ref[...], g3_ref[...], be3_ref[...])
        h4 = _ln_elu_layer(h3, w4_ref[...], b4_ref[...], g4_ref[...], be4_ref[...])
        xr = h3 + h4                                              # residual

        # Final Linear(1), computed directly in lane-dense (1, TB) orientation
        # by contracting xr's feature axis against w5^T's feature axis.
        logits = lax.dot_general(w5t_ref[...], xr,
                                 dimension_numbers=(((1,), (1,)), ((), ())),
                                 preferred_element_type=jnp.float32)  # (1, TB)
        logits = logits + b5_ref[...]                                 # (1,1)

        # Exact sigmoid (divide on a (1, TB) tile is negligible; keeps numeric
        # headroom used up by the bf16 matmul inputs).
        out_ref[...] = pl.reciprocal(1.0 + jnp.exp(-logits), approx=False)


# ------------------------------ host wrapper ------------------------------ #

def model0_pallas(indices, params, *, batch_tile=None, vocab_tile=None):
    """indices: (B, L) int32; params: dict of model parameters."""
    table = params["embedding"].astype(jnp.bfloat16)              # (V, E)
    V, E = table.shape
    B, L = indices.shape
    assert L <= 256, "bf16 token counts are exact only for L <= 256"

    # Token-count matrix (exact): counts[b, v] = #times token v appears in
    # row b.  Small integers -> exact in bf16; halves the per-step HBM stream.
    counts = jnp.zeros((B, V), jnp.float32).at[
        jnp.arange(B)[:, None], indices].add(1.0).astype(jnp.bfloat16)

    # Fold cat([sum, mean]) into W1:  [s, s/L] @ W1 == s @ (W1_top + W1_bot/L)
    w1 = params["w1"]                                             # (2E, 2H)
    w1_eff = w1[:E, :] + w1[E:, :] * (1.0 / L)                    # (E, 2H)

    w5t = params["w5"].T                                          # (1, H)
    b5 = params["b5"].reshape(1, 1)                               # (1, 1)

    # ---- batch tile: keep G even when B allows it (both v7x TCs busy) ----
    if batch_tile is not None:
        TB = batch_tile
    elif B % 256 == 0:
        TB = min(B // 2, 512)
        while B % TB:
            TB //= 2
    else:
        TB = B
    assert B % TB == 0
    assert TB == B or TB % 128 == 0, "lane-dense output needs TB % 128 == 0"
    assert TB == B or TB % 8 == 0
    G = B // TB

    # ---- vocab tile: reduction axis so large V never has to fit VMEM ----
    TV = vocab_tile or V
    assert V % TV == 0
    assert TV == V or TV % 128 == 0
    KV = V // TV

    weights = [
        w1_eff, params["b1"], params["g1"], params["be1"],
        params["w2"], params["b2"], params["g2"], params["be2"],
        params["w3"], params["b3"], params["g3"], params["be3"],
        params["w4"], params["b4"], params["g4"], params["be4"],
        w5t, b5,
    ]

    def resident(arr):
        # Constant index_map -> block index never changes, so Pallas keeps the
        # tile VMEM-resident and elides per-step weight DMAs.
        return pl.BlockSpec(arr.shape, lambda i, k: (0, 0))

    in_specs = (
        [pl.BlockSpec((TB, TV), lambda i, k: (i, k)),     # streamed counts
         pl.BlockSpec((TV, E), lambda i, k: (k, 0))]      # table (V-tiled)
        + [resident(w) for w in weights]
    )
    # Lane-dense (1, B) output, block (1, TB): full-width unmasked stores,
    # legal for any G (TB == B or TB multiple of 128).
    out_specs = pl.BlockSpec((1, TB), lambda i, k: (0, i))

    # VMEM budget: double-buffered bf16 streams + resident weights + scratch,
    # capped at 48 MiB (fits v7x's 64 MiB, above the 32 MiB scoped default).
    stream_bytes = TB * TV * 2 + TV * E * 2
    resident_bytes = sum(int(w.size) * w.dtype.itemsize for w in weights)
    scratch_bytes = TB * E * 4
    vmem_est = 2 * stream_bytes + 2 * resident_bytes + scratch_bytes
    vmem_limit = int(min(max(2 * vmem_est, 32 << 20), 48 << 20))

    out = pl.pallas_call(
        model0_kernel,
        out_shape=jax.ShapeDtypeStruct((1, B), jnp.float32),
        grid_spec=pltpu.PrefetchScalarGridSpec(
            num_scalar_prefetch=0,
            grid=(G, KV),
            in_specs=in_specs,
            out_specs=out_specs,
            scratch_shapes=[pltpu.VMEM((TB, E), jnp.float32)]),
        compiler_params=pltpu.CompilerParams(
            dimension_semantics=("parallel", "arbitrary"),
            vmem_limit_bytes=vmem_limit),
    )(counts, table, *weights)

    return out.reshape(B, 1)


# ------------------------- parameter initialization ------------------------ #

def init_params(key, vocab, in_feat, hidden):
    """Deterministic init mirroring PyTorch defaults (U(-1/sqrt(fan_in),...))."""
    ks = jax.random.split(key, 16)

    def linear(kw, kb, fan_in, fan_out):
        lim = 1.0 / jnp.sqrt(jnp.float32(fan_in))
        w = jax.random.uniform(kw, (fan_in, fan_out), jnp.float32, -lim, lim)
        b = jax.random.uniform(kb, (1, fan_out), jnp.float32, -lim, lim)
        return w, b

    emb = jax.random.normal(ks[0], (vocab, in_feat), jnp.float32)
    emb = emb.at[0].set(0.0)  # padding_idx = word2int['<PAD>'] = 0

    w1, b1 = linear(ks[1], ks[2], in_feat * 2, hidden * 2)
    w2, b2 = linear(ks[3], ks[4], hidden * 2, hidden)
    w3, b3 = linear(ks[5], ks[6], hidden, hidden)
    w4, b4 = linear(ks[7], ks[8], hidden, hidden)
    w5, b5 = linear(ks[9], ks[10], hidden, 1)

    ones = lambda n: jnp.ones((1, n), jnp.float32)
    zeros = lambda n: jnp.zeros((1, n), jnp.float32)

    return dict(
        embedding=emb,
        w1=w1, b1=b1, g1=ones(hidden * 2), be1=zeros(hidden * 2),
        w2=w2, b2=b2, g2=ones(hidden), be2=zeros(hidden),
        w3=w3, b3=b3, g3=ones(hidden), be3=zeros(hidden),
        w4=w4, b4=b4, g4=ones(hidden), be4=zeros(hidden),
        w5=w5, b5=b5,
    )


# ------------------------------ JAX reference ------------------------------ #

def model0_reference(indices, p):
    emb = jnp.take(p["embedding"], indices, axis=0).astype(jnp.float32)
    x = jnp.concatenate([jnp.sum(emb, 1), jnp.mean(emb, 1)], axis=1)

    def layer(x, w, b, g, be):
        h = x @ w + b
        mu = jnp.mean(h, -1, keepdims=True)
        var = jnp.mean((h - mu) ** 2, -1, keepdims=True)
        hn = (h - mu) / jnp.sqrt(var + 1e-5) * g + be
        return jnp.where(hn > 0, hn, jnp.exp(hn) - 1.0)

    h1 = layer(x, p["w1"], p["b1"], p["g1"], p["be1"])
    h2 = layer(h1, p["w2"], p["b2"], p["g2"], p["be2"])
    h3 = layer(h2, p["w3"], p["b3"], p["g3"], p["be3"])
    h4 = layer(h3, p["w4"], p["b4"], p["g4"], p["be4"])
    xr = h3 + h4
    return jax.nn.sigmoid(xr @ p["w5"] + p["b5"])


# ----------------------------------- main ---------------------------------- #

if __name__ == "__main__":
    VOCAB, IN_FEAT, HIDDEN = 50, 16, 32
    B, L = 8, 8

    key = jax.random.PRNGKey(0)
    k_idx, k_param = jax.random.split(key)

    params = init_params(k_param, VOCAB, IN_FEAT, HIDDEN)
    indices = jax.random.randint(k_idx, (B, L), 0, VOCAB, dtype=jnp.int32)
    indices = indices.at[:, -2:].set(0)  # a few <PAD> tokens (index 0)

    out = model0_pallas(indices, params)
    jax.block_until_ready(out)

    ref = model0_reference(indices, params)
    assert out.shape == (B, 1)
    # Tolerance accounts for bf16 counts/table matmul inputs (f32 accumulation)
    # and FP reassociation from folding sum/mean into W1; the sigmoid output
    # range compresses the resulting logit error well below 1e-2.
    assert jnp.allclose(out, ref, rtol=1e-2, atol=1e-2), "mismatch vs reference"

    print("KERNEL_OK")
</pallas_src>

<mosaic_0001>
module attributes {stable_mosaic.version = 11 : i64} {
  func.func @model0_kernel(%arg0: i32, %arg1: i32, %arg2: memref<8x50xbf16, #tpu.memory_space<vmem>>, %arg3: memref<50x16xbf16, #tpu.memory_space<vmem>>, %arg4: memref<16x64xf32, #tpu.memory_space<vmem>>, %arg5: memref<1x64xf32, #tpu.memory_space<vmem>>, %arg6: memref<1x64xf32, #tpu.memory_space<vmem>>, %arg7: memref<1x64xf32, #tpu.memory_space<vmem>>, %arg8: memref<64x32xf32, #tpu.memory_space<vmem>>, %arg9: memref<1x32xf32, #tpu.memory_space<vmem>>, %arg10: memref<1x32xf32, #tpu.memory_space<vmem>>, %arg11: memref<1x32xf32, #tpu.memory_space<vmem>>, %arg12: memref<32x32xf32, #tpu.memory_space<vmem>>, %arg13: memref<1x32xf32, #tpu.memory_space<vmem>>, %arg14: memref<1x32xf32, #tpu.memory_space<vmem>>, %arg15: memref<1x32xf32, #tpu.memory_space<vmem>>, %arg16: memref<32x32xf32, #tpu.memory_space<vmem>>, %arg17: memref<1x32xf32, #tpu.memory_space<vmem>>, %arg18: memref<1x32xf32, #tpu.memory_space<vmem>>, %arg19: memref<1x32xf32, #tpu.memory_space<vmem>>, %arg20: memref<1x32xf32, #tpu.memory_space<vmem>>, %arg21: memref<1x1xf32, #tpu.memory_space<vmem>>, %arg22: memref<1x8xf32, #tpu.memory_space<vmem>>, %arg23: memref<8x16xf32, #tpu.memory_space<vmem>>) attributes {dimension_semantics = [#tpu.dimension_semantics<parallel>, #tpu.dimension_semantics<arbitrary>], iteration_bounds = array<i64: 1, 1>, scalar_prefetch = 0 : i64, scratch_operands = 1 : i64, tpu.core_type = #tpu.core_type<tc>, window_params = [{transform_indices = @transform_0, window_bounds = array<i64: 8, 50>}, {transform_indices = @transform_1, window_bounds = array<i64: 50, 16>}, {pipeline_mode = #tpu.pipeline_mode<synchronous>, transform_indices = @transform_2, window_bounds = array<i64: 16, 64>}, {pipeline_mode = #tpu.pipeline_mode<synchronous>, transform_indices = @transform_3, window_bounds = array<i64: 1, 64>}, {pipeline_mode = #tpu.pipeline_mode<synchronous>, transform_indices = @transform_4, window_bounds = array<i64: 1, 64>}, {pipeline_mode = #tpu.pipeline_mode<synchronous>, transform_indices = @transform_5, window_bounds = array<i64: 1, 64>}, {pipeline_mode = #tpu.pipeline_mode<synchronous>, transform_indices = @transform_6, window_bounds = array<i64: 64, 32>}, {pipeline_mode = #tpu.pipeline_mode<synchronous>, transform_indices = @transform_7, window_bounds = array<i64: 1, 32>}, {pipeline_mode = #tpu.pipeline_mode<synchronous>, transform_indices = @transform_8, window_bounds = array<i64: 1, 32>}, {pipeline_mode = #tpu.pipeline_mode<synchronous>, transform_indices = @transform_9, window_bounds = array<i64: 1, 32>}, {pipeline_mode = #tpu.pipeline_mode<synchronous>, transform_indices = @transform_10, window_bounds = array<i64: 32, 32>}, {pipeline_mode = #tpu.pipeline_mode<synchronous>, transform_indices = @transform_11, window_bounds = array<i64: 1, 32>}, {pipeline_mode = #tpu.pipeline_mode<synchronous>, transform_indices = @transform_12, window_bounds = array<i64: 1, 32>}, {pipeline_mode = #tpu.pipeline_mode<synchronous>, transform_indices = @transform_13, window_bounds = array<i64: 1, 32>}, {pipeline_mode = #tpu.pipeline_mode<synchronous>, transform_indices = @transform_14, window_bounds = array<i64: 32, 32>}, {pipeline_mode = #tpu.pipeline_mode<synchronous>, transform_indices = @transform_15, window_bounds = array<i64: 1, 32>}, {pipeline_mode = #tpu.pipeline_mode<synchronous>, transform_indices = @transform_16, window_bounds = array<i64: 1, 32>}, {pipeline_mode = #tpu.pipeline_mode<synchronous>, transform_indices = @transform_17, window_bounds = array<i64: 1, 32>}, {pipeline_mode = #tpu.pipeline_mode<synchronous>, transform_indices = @transform_18, window_bounds = array<i64: 1, 32>}, {pipeline_mode = #tpu.pipeline_mode<synchronous>, transform_indices = @transform_19, window_bounds = array<i64: 1, 1>}, {transform_indices = @transform_20, window_bounds = array<i64: 1, 8>}]} {
    %c0_i32 = arith.constant 0 : i32
    %0 = arith.cmpi eq, %arg1, %c0_i32 : i32
    %1 = arith.extui %0 : i1 to i32
    %c0_i32_0 = arith.constant 0 : i32
    %2 = arith.cmpi ne, %1, %c0_i32_0 : i32
    scf.if %2 {
      %cst_10 = arith.constant 0.000000e+00 : f32
      %12 = vector.broadcast %cst_10 : f32 to vector<8x16xf32>
      %c0_11 = arith.constant 0 : index
      %c0_12 = arith.constant 0 : index
      %13 = vector.load %arg23[%c0_11, %c0_12] : memref<8x16xf32, #tpu.memory_space<vmem>>, vector<8x16xf32>
      tpu.vector_store %arg23[%c0_11, %c0_12], %12 {strides = array<i32>} : memref<8x16xf32, #tpu.memory_space<vmem>>, vector<8x16xf32>,
    } else {
    }
    %c0 = arith.constant 0 : index
    %c0_1 = arith.constant 0 : index
    %3 = vector.load %arg23[%c0, %c0_1] : memref<8x16xf32, #tpu.memory_space<vmem>>, vector<8x16xf32>
    %c0_2 = arith.constant 0 : index
    %c0_3 = arith.constant 0 : index
    %4 = vector.load %arg2[%c0_2, %c0_3] : memref<8x50xbf16, #tpu.memory_space<vmem>>, vector<8x50xbf16>
    %c0_4 = arith.constant 0 : index
    %c0_5 = arith.constant 0 : index
    %5 = vector.load %arg3[%c0_4, %c0_5] : memref<50x16xbf16, #tpu.memory_space<vmem>>, vector<50x16xbf16>
    %cst = arith.constant dense<0.000000e+00> : vector<8x16xf32>
    %6 = tpu.matmul %4, %5, %cst {dimension_numbers = #tpu.dot_dimension_numbers<[1], [0], [0], [1], [0, 0, 1, 1], [], []>} : vector<8x50xbf16>, vector<50x16xbf16>, vector<8x16xf32> -> vector<8x16xf32>
    %7 = arith.addf %3, %6 : vector<8x16xf32>
    %c0_6 = arith.constant 0 : index
    %c0_7 = arith.constant 0 : index
    %8 = vector.load %arg23[%c0_6, %c0_7] : memref<8x16xf32, #tpu.memory_space<vmem>>, vector<8x16xf32>
    tpu.vector_store %arg23[%c0_6, %c0_7], %7 {strides = array<i32>} : memref<8x16xf32, #tpu.memory_space<vmem>>, vector<8x16xf32>,
    %c0_i32_8 = arith.constant 0 : i32
    %9 = arith.cmpi eq, %arg1, %c0_i32_8 : i32
    %10 = arith.extui %9 : i1 to i32
    %c0_i32_9 = arith.constant 0 : i32
    %11 = arith.cmpi ne, %10, %c0_i32_9 : i32
    scf.if %11 {
      %c0_10 = arith.constant 0 : index
      %c0_11 = arith.constant 0 : index
      %12 = vector.load %arg23[%c0_10, %c0_11] : memref<8x16xf32, #tpu.memory_space<vmem>>, vector<8x16xf32>
      %c0_12 = arith.constant 0 : index
      %c0_13 = arith.constant 0 : index
      %13 = vector.load %arg4[%c0_12, %c0_13] : memref<16x64xf32, #tpu.memory_space<vmem>>, vector<16x64xf32>
      %c0_14 = arith.constant 0 : index
      %c0_15 = arith.constant 0 : index
      %14 = vector.load %arg5[%c0_14, %c0_15] : memref<1x64xf32, #tpu.memory_space<vmem>>, vector<1x64xf32>
      %c0_16 = arith.constant 0 : index
      %c0_17 = arith.constant 0 : index
      %15 = vector.load %arg6[%c0_16, %c0_17] : memref<1x64xf32, #tpu.memory_space<vmem>>, vector<1x64xf32>
      %c0_18 = arith.constant 0 : index
      %c0_19 = arith.constant 0 : index
      %16 = vector.load %arg7[%c0_18, %c0_19] : memref<1x64xf32, #tpu.memory_space<vmem>>, vector<1x64xf32>
      %cst_20 = arith.constant dense<0.000000e+00> : vector<8x64xf32>
      %17 = tpu.matmul %12, %13, %cst_20 {dimension_numbers = #tpu.dot_dimension_numbers<[1], [0], [0], [1], [0, 0, 1, 1], [], []>} : vector<8x16xf32>, vector<16x64xf32>, vector<8x64xf32> -> vector<8x64xf32>
      %18 = vector.broadcast %14 : vector<1x64xf32> to vector<8x64xf32>
      %19 = arith.addf %17, %18 : vector<8x64xf32>
      %cst_21 = arith.constant dense<0.000000e+00> : vector<8xf32>
      %20 = vector.multi_reduction <add>, %19, %cst_21 [1] : vector<8x64xf32> to vector<8xf32>
      %21 = vector.shape_cast %20 : vector<8xf32> to vector<8x1xf32>
      %cst_22 = arith.constant 6.400000e+01 : f32
      %22 = vector.broadcast %cst_22 : f32 to vector<8x1xf32>
      %23 = arith.divf %21, %22 : vector<8x1xf32>
      %24 = arith.mulf %19, %19 : vector<8x64xf32>
      %cst_23 = arith.constant dense<0.000000e+00> : vector<8xf32>
      %25 = vector.multi_reduction <add>, %24, %cst_23 [1] : vector<8x64xf32> to vector<8xf32>
      %26 = vector.shape_cast %25 : vector<8xf32> to vector<8x1xf32>
      %cst_24 = arith.constant 6.400000e+01 : f32
      %27 = vector.broadcast %cst_24 : f32 to vector<8x1xf32>
      %28 = arith.divf %26, %27 : vector<8x1xf32>
      %29 = vector.broadcast %23 : vector<8x1xf32> to vector<8x64xf32>
      %30 = arith.subf %19, %29 : vector<8x64xf32>
      %31 = arith.mulf %23, %23 : vector<8x1xf32>
      %32 = arith.subf %28, %31 : vector<8x1xf32>
      %cst_25 = arith.constant 9.99999974E-6 : f32
      %33 = vector.broadcast %cst_25 : f32 to vector<8x1xf32>
      %34 = arith.addf %32, %33 : vector<8x1xf32>
      %35 = math.rsqrt %34 : vector<8x1xf32>
      %36 = vector.broadcast %35 : vector<8x1xf32> to vector<8x64xf32>
      %37 = arith.mulf %30, %36 : vector<8x64xf32>
      %38 = vector.broadcast %15 : vector<1x64xf32> to vector<8x64xf32>
      %39 = arith.mulf %37, %38 : vector<8x64xf32>
      %40 = vector.broadcast %16 : vector<1x64xf32> to vector<8x64xf32>
      %41 = arith.addf %39, %40 : vector<8x64xf32>
      %cst_26 = arith.constant 0.000000e+00 : f32
      %42 = vector.broadcast %cst_26 : f32 to vector<8x64xf32>
      %43 = arith.cmpf ogt, %41, %42 : vector<8x64xf32>
      %44 = math.exp %41 : vector<8x64xf32>
      %cst_27 = arith.constant 1.000000e+00 : f32
      %45 = vector.broadcast %cst_27 : f32 to vector<8x64xf32>
      %46 = arith.subf %44, %45 : vector<8x64xf32>
      %47 = arith.select %43, %41, %46 : vector<8x64xi1>, vector<8x64xf32>
      %c0_28 = arith.constant 0 : index
      %c0_29 = arith.constant 0 : index
      %48 = vector.load %arg8[%c0_28, %c0_29] : memref<64x32xf32, #tpu.memory_space<vmem>>, vector<64x32xf32>
      %c0_30 = arith.constant 0 : index
      %c0_31 = arith.constant 0 : index
      %49 = vector.load %arg9[%c0_30, %c0_31] : memref<1x32xf32, #tpu.memory_space<vmem>>, vector<1x32xf32>
      %c0_32 = arith.constant 0 : index
      %c0_33 = arith.constant 0 : index
      %50 = vector.load %arg10[%c0_32, %c0_33] : memref<1x32xf32, #tpu.memory_space<vmem>>, vector<1x32xf32>
      %c0_34 = arith.constant 0 : index
      %c0_35 = arith.constant 0 : index
      %51 = vector.load %arg11[%c0_34, %c0_35] : memref<1x32xf32, #tpu.memory_space<vmem>>, vector<1x32xf32>
      %cst_36 = arith.constant dense<0.000000e+00> : vector<8x32xf32>
      %52 = tpu.matmul %47, %48, %cst_36 {dimension_numbers = #tpu.dot_dimension_numbers<[1], [0], [0], [1], [0, 0, 1, 1], [], []>} : vector<8x64xf32>, vector<64x32xf32>, vector<8x32xf32> -> vector<8x32xf32>
      %53 = vector.broadcast %49 : vector<1x32xf32> to vector<8x32xf32>
      %54 = arith.addf %52, %53 : vector<8x32xf32>
      %cst_37 = arith.constant dense<0.000000e+00> : vector<8xf32>
      %55 = vector.multi_reduction <add>, %54, %cst_37 [1] : vector<8x32xf32> to vector<8xf32>
      %56 = vector.shape_cast %55 : vector<8xf32> to vector<8x1xf32>
      %cst_38 = arith.constant 3.200000e+01 : f32
      %57 = vector.broadcast %cst_38 : f32 to vector<8x1xf32>
      %58 = arith.divf %56, %57 : vector<8x1xf32>
      %59 = arith.mulf %54, %54 : vector<8x32xf32>
      %cst_39 = arith.constant dense<0.000000e+00> : vector<8xf32>
      %60 = vector.multi_reduction <add>, %59, %cst_39 [1] : vector<8x32xf32> to vector<8xf32>
      %61 = vector.shape_cast %60 : vector<8xf32> to vector<8x1xf32>
      %cst_40 = arith.constant 3.200000e+01 : f32
      %62 = vector.broadcast %cst_40 : f32 to vector<8x1xf32>
      %63 = arith.divf %61, %62 : vector<8x1xf32>
      %64 = vector.broadcast %58 : vector<8x1xf32> to vector<8x32xf32>
      %65 = arith.subf %54, %64 : vector<8x32xf32>
      %66 = arith.mulf %58, %58 : vector<8x1xf32>
      %67 = arith.subf %63, %66 : vector<8x1xf32>
      %cst_41 = arith.constant 9.99999974E-6 : f32
      %68 = vector.broadcast %cst_41 : f32 to vector<8x1xf32>
      %69 = arith.addf %67, %68 : vector<8x1xf32>
      %70 = math.rsqrt %69 : vector<8x1xf32>
      %71 = vector.broadcast %70 : vector<8x1xf32> to vector<8x32xf32>
      %72 = arith.mulf %65, %71 : vector<8x32xf32>
      %73 = vector.broadcast %50 : vector<1x32xf32> to vector<8x32xf32>
      %74 = arith.mulf %72, %73 : vector<8x32xf32>
      %75 = vector.broadcast %51 : vector<1x32xf32> to vector<8x32xf32>
      %76 = arith.addf %74, %75 : vector<8x32xf32>
      %cst_42 = arith.constant 0.000000e+00 : f32
      %77 = vector.broadcast %cst_42 : f32 to vector<8x32xf32>
      %78 = arith.cmpf ogt, %76, %77 : vector<8x32xf32>
      %79 = math.exp %76 : vector<8x32xf32>
      %cst_43 = arith.constant 1.000000e+00 : f32
      %80 = vector.broadcast %cst_43 : f32 to vector<8x32xf32>
      %81 = arith.subf %79, %80 : vector<8x32xf32>
      %82 = arith.select %78, %76, %81 : vector<8x32xi1>, vector<8x32xf32>
      %c0_44 = arith.constant 0 : index
      %c0_45 = arith.constant 0 : index
      %83 = vector.load %arg12[%c0_44, %c0_45] : memref<32x32xf32, #tpu.memory_space<vmem>>, vector<32x32xf32>
      %c0_46 = arith.constant 0 : index
      %c0_47 = arith.constant 0 : index
      %84 = vector.load %arg13[%c0_46, %c0_47] : memref<1x32xf32, #tpu.memory_space<vmem>>, vector<1x32xf32>
      %c0_48 = arith.constant 0 : index
      %c0_49 = arith.constant 0 : index
      %85 = vector.load %arg14[%c0_48, %c0_49] : memref<1x32xf32, #tpu.memory_space<vmem>>, vector<1x32xf32>
      %c0_50 = arith.constant 0 : index
      %c0_51 = arith.constant 0 : index
      %86 = vector.load %arg15[%c0_50, %c0_51] : memref<1x32xf32, #tpu.memory_space<vmem>>, vector<1x32xf32>
      %cst_52 = arith.constant dense<0.000000e+00> : vector<8x32xf32>
      %87 = tpu.matmul %82, %83, %cst_52 {dimension_numbers = #tpu.dot_dimension_numbers<[1], [0], [0], [1], [0, 0, 1, 1], [], []>} : vector<8x32xf32>, vector<32x32xf32>, vector<8x32xf32> -> vector<8x32xf32>
      %88 = vector.broadcast %84 : vector<1x32xf32> to vector<8x32xf32>
      %89 = arith.addf %87, %88 : vector<8x32xf32>
      %cst_53 = arith.constant dense<0.000000e+00> : vector<8xf32>
      %90 = vector.multi_reduction <add>, %89, %cst_53 [1] : vector<8x32xf32> to vector<8xf32>
      %91 = vector.shape_cast %90 : vector<8xf32> to vector<8x1xf32>
      %cst_54 = arith.constant 3.200000e+01 : f32
      %92 = vector.broadcast %cst_54 : f32 to vector<8x1xf32>
      %93 = arith.divf %91, %92 : vector<8x1xf32>
      %94 = arith.mulf %89, %89 : vector<8x32xf32>
      %cst_55 = arith.constant dense<0.000000e+00> : vector<8xf32>
      %95 = vector.multi_reduction <add>, %94, %cst_55 [1] : vector<8x32xf32> to vector<8xf32>
      %96 = vector.shape_cast %95 : vector<8xf32> to vector<8x1xf32>
      %cst_56 = arith.constant 3.200000e+01 : f32
      %97 = vector.broadcast %cst_56 : f32 to vector<8x1xf32>
      %98 = arith.divf %96, %97 : vector<8x1xf32>
      %99 = vector.broadcast %93 : vector<8x1xf32> to vector<8x32xf32>
      %100 = arith.subf %89, %99 : vector<8x32xf32>
      %101 = arith.mulf %93, %93 : vector<8x1xf32>
      %102 = arith.subf %98, %101 : vector<8x1xf32>
      %cst_57 = arith.constant 9.99999974E-6 : f32
      %103 = vector.broadcast %cst_57 : f32 to vector<8x1xf32>
      %104 = arith.addf %102, %103 : vector<8x1xf32>
      %105 = math.rsqrt %104 : vector<8x1xf32>
      %106 = vector.broadcast %105 : vector<8x1xf32> to vector<8x32xf32>
      %107 = arith.mulf %100, %106 : vector<8x32xf32>
      %108 = vector.broadcast %85 : vector<1x32xf32> to vector<8x32xf32>
      %109 = arith.mulf %107, %108 : vector<8x32xf32>
      %110 = vector.broadcast %86 : vector<1x32xf32> to vector<8x32xf32>
      %111 = arith.addf %109, %110 : vector<8x32xf32>
      %cst_58 = arith.constant 0.000000e+00 : f32
      %112 = vector.broadcast %cst_58 : f32 to vector<8x32xf32>
      %113 = arith.cmpf ogt, %111, %112 : vector<8x32xf32>
      %114 = math.exp %111 : vector<8x32xf32>
      %cst_59 = arith.constant 1.000000e+00 : f32
      %115 = vector.broadcast %cst_59 : f32 to vector<8x32xf32>
      %116 = arith.subf %114, %115 : vector<8x32xf32>
      %117 = arith.select %113, %111, %116 : vector<8x32xi1>, vector<8x32xf32>
      %c0_60 = arith.constant 0 : index
      %c0_61 = arith.constant 0 : index
      %118 = vector.load %arg16[%c0_60, %c0_61] : memref<32x32xf32, #tpu.memory_space<vmem>>, vector<32x32xf32>
      %c0_62 = arith.constant 0 : index
      %c0_63 = arith.constant 0 : index
      %119 = vector.load %arg17[%c0_62, %c0_63] : memref<1x32xf32, #tpu.memory_space<vmem>>, vector<1x32xf32>
      %c0_64 = arith.constant 0 : index
      %c0_65 = arith.constant 0 : index
      %120 = vector.load %arg18[%c0_64, %c0_65] : memref<1x32xf32, #tpu.memory_space<vmem>>, vector<1x32xf32>
      %c0_66 = arith.constant 0 : index
      %c0_67 = arith.constant 0 : index
      %121 = vector.load %arg19[%c0_66, %c0_67] : memref<1x32xf32, #tpu.memory_space<vmem>>, vector<1x32xf32>
      %cst_68 = arith.constant dense<0.000000e+00> : vector<8x32xf32>
      %122 = tpu.matmul %117, %118, %cst_68 {dimension_numbers = #tpu.dot_dimension_numbers<[1], [0], [0], [1], [0, 0, 1, 1], [], []>} : vector<8x32xf32>, vector<32x32xf32>, vector<8x32xf32> -> vector<8x32xf32>
      %123 = vector.broadcast %119 : vector<1x32xf32> to vector<8x32xf32>
      %124 = arith.addf %122, %123 : vector<8x32xf32>
      %cst_69 = arith.constant dense<0.000000e+00> : vector<8xf32>
      %125 = vector.multi_reduction <add>, %124, %cst_69 [1] : vector<8x32xf32> to vector<8xf32>
      %126 = vector.shape_cast %125 : vector<8xf32> to vector<8x1xf32>
      %cst_70 = arith.constant 3.200000e+01 : f32
      %127 = vector.broadcast %cst_70 : f32 to vector<8x1xf32>
      %128 = arith.divf %126, %127 : vector<8x1xf32>
      %129 = arith.mulf %124, %124 : vector<8x32xf32>
      %cst_71 = arith.constant dense<0.000000e+00> : vector<8xf32>
      %130 = vector.multi_reduction <add>, %129, %cst_71 [1] : vector<8x32xf32> to vector<8xf32>
      %131 = vector.shape_cast %130 : vector<8xf32> to vector<8x1xf32>
      %cst_72 = arith.constant 3.200000e+01 : f32
      %132 = vector.broadcast %cst_72 : f32 to vector<8x1xf32>
      %133 = arith.divf %131, %132 : vector<8x1xf32>
      %134 = vector.broadcast %128 : vector<8x1xf32> to vector<8x32xf32>
      %135 = arith.subf %124, %134 : vector<8x32xf32>
      %136 = arith.mulf %128, %128 : vector<8x1xf32>
      %137 = arith.subf %133, %136 : vector<8x1xf32>
      %cst_73 = arith.constant 9.99999974E-6 : f32
      %138 = vector.broadcast %cst_73 : f32 to vector<8x1xf32>
      %139 = arith.addf %137, %138 : vector<8x1xf32>
      %140 = math.rsqrt %139 : vector<8x1xf32>
      %141 = vector.broadcast %140 : vector<8x1xf32> to vector<8x32xf32>
      %142 = arith.mulf %135, %141 : vector<8x32xf32>
      %143 = vector.broadcast %120 : vector<1x32xf32> to vector<8x32xf32>
      %144 = arith.mulf %142, %143 : vector<8x32xf32>
      %145 = vector.broadcast %121 : vector<1x32xf32> to vector<8x32xf32>
      %146 = arith.addf %144, %145 : vector<8x32xf32>
      %cst_74 = arith.constant 0.000000e+00 : f32
      %147 = vector.broadcast %cst_74 : f32 to vector<8x32xf32>
      %148 = arith.cmpf ogt, %146, %147 : vector<8x32xf32>
      %149 = math.exp %146 : vector<8x32xf32>
      %cst_75 = arith.constant 1.000000e+00 : f32
      %150 = vector.broadcast %cst_75 : f32 to vector<8x32xf32>
      %151 = arith.subf %149, %150 : vector<8x32xf32>
      %152 = arith.select %148, %146, %151 : vector<8x32xi1>, vector<8x32xf32>
      %153 = arith.addf %117, %152 : vector<8x32xf32>
      %c0_76 = arith.constant 0 : index
      %c0_77 = arith.constant 0 : index
      %154 = vector.load %arg20[%c0_76, %c0_77] : memref<1x32xf32, #tpu.memory_space<vmem>>, vector<1x32xf32>
      %cst_78 = arith.constant dense<0.000000e+00> : vector<1x8xf32>
      %155 = tpu.matmul %154, %153, %cst_78 {dimension_numbers = #tpu.dot_dimension_numbers<[1], [1], [0], [0], [0, 0, 1, 0], [], []>} : vector<1x32xf32>, vector<8x32xf32>, vector<1x8xf32> -> vector<1x8xf32>
      %c0_79 = arith.constant 0 : index
      %c0_80 = arith.constant 0 : index
      %156 = vector.load %arg21[%c0_79, %c0_80] : memref<1x1xf32, #tpu.memory_space<vmem>>, vector<1x1xf32>
      %157 = vector.broadcast %156 : vector<1x1xf32> to vector<1x8xf32>
      %158 = arith.addf %155, %157 : vector<1x8xf32>
      %cst_81 = arith.constant 0.000000e+00 : f32
      %159 = vector.broadcast %cst_81 : f32 to vector<1x8xf32>
      %160 = arith.subf %159, %158 : vector<1x8xf32>
      %161 = math.exp %160 : vector<1x8xf32>
      %cst_82 = arith.constant 1.000000e+00 : f32
      %162 = vector.broadcast %cst_82 : f32 to vector<1x8xf32>
      %163 = arith.addf %162, %161 : vector<1x8xf32>
      %164 = tpu.reciprocal %163 : vector<1x8xf32> -> vector<1x8xf32>
      %c0_83 = arith.constant 0 : index
      %c0_84 = arith.constant 0 : index
      %165 = vector.load %arg22[%c0_83, %c0_84] : memref<1x8xf32, #tpu.memory_space<vmem>>, vector<1x8xf32>
      tpu.vector_store %arg22[%c0_83, %c0_84], %164 {strides = array<i32>} : memref<1x8xf32, #tpu.memory_space<vmem>>, vector<1x8xf32>,
    } else {
    }
    return
  }
  func.func @transform_0(%arg0: i32, %arg1: i32) -> (i32, i32) {
    %c0_i32 = arith.constant 0 : i32
    return %arg0, %arg1 : i32, i32
  }
  func.func @transform_1(%arg0: i32, %arg1: i32) -> (i32, i32) {
    %c0_i32 = arith.constant 0 : i32
    %c0_i32_0 = arith.constant 0 : i32
    return %arg1, %c0_i32 : i32, i32
  }
  func.func @transform_2(%arg0: i32, %arg1: i32) -> (i32, i32) {
    %c0_i32 = arith.constant 0 : i32
    %c0_i32_0 = arith.constant 0 : i32
    %c0_i32_1 = arith.constant 0 : i32
    return %c0_i32, %c0_i32_0 : i32, i32
  }
  func.func @transform_3(%arg0: i32, %arg1: i32) -> (i32, i32) {
    %c0_i32 = arith.constant 0 : i32
    %c0_i32_0 = arith.constant 0 : i32
    %c0_i32_1 = arith.constant 0 : i32
    return %c0_i32, %c0_i32_0 : i32, i32
  }
  func.func @transform_4(%arg0: i32, %arg1: i32) -> (i32, i32) {
    %c0_i32 = arith.constant 0 : i32
    %c0_i32_0 = arith.constant 0 : i32
    %c0_i32_1 = arith.constant 0 : i32
    return %c0_i32, %c0_i32_0 : i32, i32
  }
  func.func @transform_5(%arg0: i32, %arg1: i32) -> (i32, i32) {
    %c0_i32 = arith.constant 0 : i32
    %c0_i32_0 = arith.constant 0 : i32
    %c0_i32_1 = arith.constant 0 : i32
    return %c0_i32, %c0_i32_0 : i32, i32
  }
  func.func @transform_6(%arg0: i32, %arg1: i32) -> (i32, i32) {
    %c0_i32 = arith.constant 0 : i32
    %c0_i32_0 = arith.constant 0 : i32
    %c0_i32_1 = arith.constant 0 : i32
    return %c0_i32, %c0_i32_0 : i32, i32
  }
  func.func @transform_7(%arg0: i32, %arg1: i32) -> (i32, i32) {
    %c0_i32 = arith.constant 0 : i32
    %c0_i32_0 = arith.constant 0 : i32
    %c0_i32_1 = arith.constant 0 : i32
    return %c0_i32, %c0_i32_0 : i32, i32
  }
  func.func @transform_8(%arg0: i32, %arg1: i32) -> (i32, i32) {
    %c0_i32 = arith.constant 0 : i32
    %c0_i32_0 = arith.constant 0 : i32
    %c0_i32_1 = arith.constant 0 : i32
    return %c0_i32, %c0_i32_0 : i32, i32
  }
  func.func @transform_9(%arg0: i32, %arg1: i32) -> (i32, i32) {
    %c0_i32 = arith.constant 0 : i32
    %c0_i32_0 = arith.constant 0 : i32
    %c0_i32_1 = arith.constant 0 : i32
    return %c0_i32, %c0_i32_0 : i32, i32
  }
  func.func @transform_10(%arg0: i32, %arg1: i32) -> (i32, i32) {
    %c0_i32 = arith.constant 0 : i32
    %c0_i32_0 = arith.constant 0 : i32
    %c0_i32_1 = arith.constant 0 : i32
    return %c0_i32, %c0_i32_0 : i32, i32
  }
  func.func @transform_11(%arg0: i32, %arg1: i32) -> (i32, i32) {
    %c0_i32 = arith.constant 0 : i32
    %c0_i32_0 = arith.constant 0 : i32
    %c0_i32_1 = arith.constant 0 : i32
    return %c0_i32, %c0_i32_0 : i32, i32
  }
  func.func @transform_12(%arg0: i32, %arg1: i32) -> (i32, i32) {
    %c0_i32 = arith.constant 0 : i32
    %c0_i32_0 = arith.constant 0 : i32
    %c0_i32_1 = arith.constant 0 : i32
    return %c0_i32, %c0_i32_0 : i32, i32
  }
  func.func @transform_13(%arg0: i32, %arg1: i32) -> (i32, i32) {
    %c0_i32 = arith.constant 0 : i32
    %c0_i32_0 = arith.constant 0 : i32
    %c0_i32_1 = arith.constant 0 : i32
    return %c0_i32, %c0_i32_0 : i32, i32
  }
  func.func @transform_14(%arg0: i32, %arg1: i32) -> (i32, i32) {
    %c0_i32 = arith.constant 0 : i32
    %c0_i32_0 = arith.constant 0 : i32
    %c0_i32_1 = arith.constant 0 : i32
    return %c0_i32, %c0_i32_0 : i32, i32
  }
  func.func @transform_15(%arg0: i32, %arg1: i32) -> (i32, i32) {
    %c0_i32 = arith.constant 0 : i32
    %c0_i32_0 = arith.constant 0 : i32
    %c0_i32_1 = arith.constant 0 : i32
    return %c0_i32, %c0_i32_0 : i32, i32
  }
  func.func @transform_16(%arg0: i32, %arg1: i32) -> (i32, i32) {
    %c0_i32 = arith.constant 0 : i32
    %c0_i32_0 = arith.constant 0 : i32
    %c0_i32_1 = arith.constant 0 : i32
    return %c0_i32, %c0_i32_0 : i32, i32
  }
  func.func @transform_17(%arg0: i32, %arg1: i32) -> (i32, i32) {
    %c0_i32 = arith.constant 0 : i32
    %c0_i32_0 = arith.constant 0 : i32
    %c0_i32_1 = arith.constant 0 : i32
    return %c0_i32, %c0_i32_0 : i32, i32
  }
  func.func @transform_18(%arg0: i32, %arg1: i32) -> (i32, i32) {
    %c0_i32 = arith.constant 0 : i32
    %c0_i32_0 = arith.constant 0 : i32
    %c0_i32_1 = arith.constant 0 : i32
    return %c0_i32, %c0_i32_0 : i32, i32
  }
  func.func @transform_19(%arg0: i32, %arg1: i32) -> (i32, i32) {
    %c0_i32 = arith.constant 0 : i32
    %c0_i32_0 = arith.constant 0 : i32
    %c0_i32_1 = arith.constant 0 : i32
    return %c0_i32, %c0_i32_0 : i32, i32
  }
  func.func @transform_20(%arg0: i32, %arg1: i32) -> (i32, i32) {
    %c0_i32 = arith.constant 0 : i32
    %c0_i32_0 = arith.constant 0 : i32
    return %c0_i32, %arg0 : i32, i32
  }
}

</mosaic_0001>

<bundles_post_ra>
// kernel: tpu_custom_call.1
= control target key start
LH: loop header
LB: loop body
LE: loop exit
PB: predicated region body
PF: predicated region fallthrough
CT: control target
= control target key end

     0   :  { %s845_s0 = inlined_call_operand.vmem [shape: bf16[8,50], index: 0, kind: input, shape index: {}]   ;;  %s846_s1 = inlined_call_operand.vmem [shape: bf16[50,16], index: 1, kind: input, shape index: {}]   ;;  %s847_s2 = inlined_call_operand.vmem [shape: f32[16,64], index: 2, kind: input, shape index: {}]   ;;  %s848_s3 = inlined_call_operand.vmem [shape: f32[1,64], index: 3, kind: input, shape index: {}]   ;;  %s849_s4 = inlined_call_operand.vmem [shape: f32[1,64], index: 4, kind: input, shape index: {}]   ;;  %s850_s5 = inlined_call_operand.vmem [shape: f32[1,64], index: 5, kind: input, shape index: {}]   ;;  %s851_s6 = inlined_call_operand.vmem [shape: f32[64,32], index: 6, kind: input, shape index: {}]   ;;  %s852_s7 = inlined_call_operand.vmem [shape: f32[1,32], index: 7, kind: input, shape index: {}]   ;;  %s853_s8 = inlined_call_operand.vmem [shape: f32[1,32], index: 8, kind: input, shape index: {}]   ;;  %s854_s9 = inlined_call_operand.vmem [shape: f32[1,32], index: 9, kind: input, shape index: {}]   ;;  %s855_s10 = inlined_call_operand.vmem [shape: f32[32,32], index: 10, kind: input, shape index: {}]   ;;  %s856_s11 = inlined_call_operand.vmem [shape: f32[1,32], index: 11, kind: input, shape index: {}]   ;;  %s857_s12 = inlined_call_operand.vmem [shape: f32[1,32], index: 12, kind: input, shape index: {}]   ;;  %s858_s13 = inlined_call_operand.vmem [shape: f32[1,32], index: 13, kind: input, shape index: {}]   ;;  %s859_s14 = inlined_call_operand.vmem [shape: f32[32,32], index: 14, kind: input, shape index: {}]   ;;  %s860_s15 = inlined_call_operand.vmem [shape: f32[1,32], index: 15, kind: input, shape index: {}]   ;;  %s861_s16 = inlined_call_operand.vmem [shape: f32[1,32], index: 16, kind: input, shape index: {}]   ;;  %s862_s17 = inlined_call_operand.vmem [shape: f32[1,32], index: 17, kind: input, shape index: {}]   ;;  %s863_s18 = inlined_call_operand.vmem [shape: f32[1,32], index: 18, kind: input, shape index: {}]   ;;  %s864_s19 = inlined_call_operand.<no memory space> [shape: f32[1,1], index: 19, kind: input, shape index: {}]   ;;  %s865_s20 = inlined_call_operand.hbm [shape: f32[1,8], index: 20, kind: output, shape index: {}]  }
   0x1   :  { %868 = sst [smem:[#allocation7_spill]] %s845_s0  ;;  %v25_v0 = vstv %s864_s19 }
   0x2   :  { %869 = sst [smem:[#allocation8_spill]] %s846_s1  ;;  %26 = vst [vmem:[#allocation3] sm:$0x1] %v25_v0 }
   0x3   :  { %870 = sst [smem:[#allocation9_spill]] %s847_s2 }
   0x4   :  { %871 = sst [smem:[#allocation10_spill]] %s848_s3 }
   0x5   :  { %872 = sst [smem:[#allocation11_spill]] %s849_s4 }
   0x6   :  { %s873_s2 = sld [smem:[#allocation8_spill]]  ;;  %vm73_vm0 = vcmask 130048   ;;  %vm109_vm1 = vcmask 1040384   ;;  %v597_v3 = vmov 0.0  }
   0x7   :  { %74 = vst.msk [vmem:[#allocation2] sm:$0xff] %vm73_vm0, %v597_v3 }
   0xc   :  { %v83_v1 = vld [vmem:[%s873_s2 + $0x18] sm:$0x1]  ;;  %v527_v6 = vld [vmem:[%s873_s2 + $0x10] sm:$0xff] }
   0xd   :  { %v97_v2 = vunpack.c.l.b16 %v83_v1 }
   0xf   :  { %v101_v4 = vpack.c.b16 %v97_v2, %v97_v2 }
  0x11   :  { %v111_v5 = vsel %vm109_vm1, %v101_v4, 0 }
  0x12   :  { %117 = vmatpush.bf16.msra.mxu0 %v111_v5 }
  0x13   :  { %27 = vsyncpa [#allocation5], 0  ;;  %v526_v7 = vld [vmem:[%s873_s2 + $0x8] sm:$0xff]  ;;  %v525_v8 = vld [vmem:[%s873_s2] sm:$0xff]  ;;  %s874_s30 = sld [smem:[#allocation7_spill]]  ;;  %vm105_vm2 = vcmask 408576  }
  0x14   :  { %s875_s1 = sld [smem:[#allocation9_spill]]  ;;  %v75_v12 = vld [vmem:[#allocation2] sm:$0xff]  ;;  %vm164_vm3 = vcmask 523264   ;;  %v598_v23 = vmov 64.0   ;;  %v216_v30 = vld [vmem:[%s851_s6 + $0x38] sm:$0xff]  ;;  %v215_v31 = vld [vmem:[%s851_s6 + $0x30] sm:$0xff] }
  0x15   :  { %s876_s25 = sld [smem:[#allocation10_spill]]  ;;  %547 = vrcp.f32 %v598_v23  ;;  %234 = vmatpush.msra.mxu2 %v216_v30  ;;  %v214_v33 = vld [vmem:[%s851_s6 + $0x28] sm:$0xff]  ;;  %v213_v34 = vld [vmem:[%s851_s6 + $0x20] sm:$0xff]  ;;  %v212_v36 = vld [vmem:[%s851_s6 + $0x18] sm:$0xff]  ;;  %vm246_vm9 = vcmask 261120   ;;  %v599_v4 = vmov 32.0  }
  0x16   :  { %118 = vmatpush.bf16.msra.mxu0 %v527_v6  ;;  %v211_v38 = vld [vmem:[%s851_s6 + $0x10] sm:$0xff]  ;;  %v210_v41 = vld [vmem:[%s851_s6 + $0x8] sm:$0xff]  ;;  %v209_v43 = vld [vmem:[%s851_s6] sm:$0xff]  ;;  %s877_s26 = sld [smem:[#allocation11_spill]] }
  0x17   :  { %235 = vmatpush.msra.mxu2 %v215_v31  ;;  %v537_v55 = vld [vmem:[%s850_s5] ss:$0 sm:$0xff] }
  0x18   :  { %v538_v62 = vld [vmem:[%s852_s7] ss:$0 sm:$0xff] }
  0x19   :  { %v76_v9 = vld [vmem:[%s874_s30] sm:$0xf]  ;;  %236 = vmatpush.msra.mxu2 %v214_v33 }
  0x1a   :  { %119 = vmatpush.bf16.msra.mxu0 %v526_v7  ;;  %v134_v10 = vld [vmem:[%s875_s1 + $0x8] sm:$0xff]  ;;  %v133_v11 = vld [vmem:[%s875_s1] sm:$0xff] }
  0x1b   :  { %158 = vmatpush.msra.mxu1 %v134_v10  ;;  %v535_v17 = vld [vmem:[%s876_s25] ss:$0 sm:$0xff]  ;;  %v548_v24 = vpop.eup %547  ;;  %237 = vmatpush.msra.mxu2 %v213_v34 }
  0x1c   :  { %v169_v25 = vmul.f32 64.0, %v548_v24  ;;  %vm173_vm4 = vweird.f32 %v548_v24  ;;  %v536_v52 = vld [vmem:[%s877_s26] ss:$0 sm:$0xff] }
  0x1d   :  { %159 = vmatpush.msra.mxu1 %v133_v11  ;;  %238 = vmatpush.msra.mxu2 %v212_v36  ;;  %v294_v11 = vld [vmem:[%s855_s10 + $0x18] sm:$0xff] }
  0x1e   :  { %120 = vmatpush.bf16.msra.mxu0 %v525_v8  ;;  %v170_v26 = vsub.f32 1.0, %v169_v25  ;;  %316 = vmatpush.msra.mxu3 %v294_v11 }
  0x1f   :  { %239 = vmatpush.msra.mxu2 %v211_v38 }
  0x20   :  { %v171_v27 = vmul.f32 %v548_v24, %v170_v26 }
  0x21   :  { %514 = vmatmul.msk.bf16.vlgmr.msra.gmra.mxu0 %vm105_vm2, %v76_v9  ;;  %240 = vmatpush.msra.mxu2 %v210_v41 }
  0x22   :  { %v172_v28 = vadd.f32 %v548_v24, %v171_v27 }
  0x23   :  { %241 = vmatpush.msra.mxu2 %v209_v43 }
  0x24   :  { %v174_v32 = vsel %vm173_vm4, %v548_v24, %v172_v28 }
  0x9e   :  { %v122_v13 = vpop.f32.mrf.mxu0 }
  0x9f   :  { %v126_v14 = vadd.f32 %v122_v13, %v75_v12  ;;  %v293_v12 = vld [vmem:[%s855_s10 + $0x10] sm:$0xff] }
  0xa0   :  { %317 = vmatpush.msra.mxu3 %v293_v12 }
  0xa1   :  { %128 = vst.msk [vmem:[#allocation2] sm:$0xff] %vm73_vm0, %v126_v14  ;;  %v292_v14 = vld [vmem:[%s855_s10 + $0x8] sm:$0xff] }
  0xa2   :  { %318 = vmatpush.msra.mxu3 %v292_v14 }
  0xa6   :  { %v124_v15 = vpop.f32.mrf.mxu0 }
  0xa7   :  { %v291_v15 = vld [vmem:[%s855_s10] sm:$0xff]  ;;  %s493_s10 = sshll.u32 %s865_s20, 4  ;;  %s494_s10 = int_to_ptr.hbm [resolvable:$true] %s493_s10 }
  0xa8   :  { %v132_v16 = vld [vmem:[#allocation2] sm:$0xff]  ;;  %319 = vmatpush.msra.mxu3 %v291_v15 }
  0xa9   :  { %515 = vmatmul.msk.f32.vlgmr.msra.gmra.mxu1 %vm73_vm0, %v132_v16 }
 0x126   :  { %v161_v18 = vpop.f32.mrf.mxu1 }
 0x127   :  { %v162_v19 = vadd.f32 %v535_v17, %v161_v18 }
 0x129   :  { %v165_v20 = vsel %vm164_vm3, %v162_v19, 0.0  ;;  %v176_v21 = vmul.f32 %v162_v19, %v162_v19 }
 0x12a   :  { %166 = vadd.xlane.f32.xlu0 %v165_v20 }
 0x12b   :  { %v177_v22 = vsel %vm164_vm3, %v176_v21, 0.0 }
 0x132   :  { %178 = vadd.xlane.f32.xlu0 %v177_v22 }
 0x19d   :  { %v167_v29 = vpop.xlane.xlu0 %166 }
 0x19e   :  { %v175_v35 = vmul.f32 %v174_v32, %v167_v29  ;;  %v539_v29 = vld [vmem:[%s853_s8] ss:$0 sm:$0xff] }
 0x1a0   :  { %v182_v39 = vmul.f32 %v175_v35, %v175_v35  ;;  %v181_v51 = vsub.f32 %v162_v19, %v175_v35 }
 0x1a5   :  { %v179_v37 = vpop.xlane.xlu0 %178 }
 0x1a6   :  { %v180_v40 = vmul.f32 %v179_v37, %v174_v32  ;;  %v540_v32 = vld [vmem:[%s854_s9] ss:$0 sm:$0xff] }
 0x1a8   :  { %v183_v42 = vsub.f32 %v180_v40, %v182_v39  ;;  %v541_v39 = vld [vmem:[%s856_s11] ss:$0 sm:$0xff] }
 0x1aa   :  { %v184_v44 = vadd.f32 1e-05, %v183_v42 }
 0x1ac   :  { %549 = vrsqrt.f32 %v184_v44  ;;  %vm191_vm6 = vweird.f32 %v184_v44 }
 0x1b2   :  { %v550_v45 = vpop.eup %549 }
 0x1b3   :  { %v186_v46 = vmul.f32 %v550_v45, %v184_v44  ;;  %vm192_vm5 = vweird.f32 %v550_v45 }
 0x1b4   :  { %vm193_vm7 = vmor %vm191_vm6, %vm192_vm5 }
 0x1b5   :  { %v187_v47 = vmul.f32 %v550_v45, %v186_v46  ;;  %v364_v46 = vld [vmem:[%s859_s14 + $0x18] sm:$0xff] }
 0x1b6   :  { %386 = vmatpush.msrb.mxu1 %v364_v46 }
 0x1b7   :  { %v188_v48 = vmul.f32 0.5, %v187_v47  ;;  %v363_v47 = vld [vmem:[%s859_s14 + $0x10] sm:$0xff] }
 0x1b8   :  { %387 = vmatpush.msrb.mxu1 %v363_v47 }
 0x1b9   :  { %v189_v49 = vsub.f32 1.5, %v188_v48  ;;  %v362_v48 = vld [vmem:[%s859_s14 + $0x8] sm:$0xff] }
 0x1ba   :  { %388 = vmatpush.msrb.mxu1 %v362_v48 }
 0x1bb   :  { %v190_v50 = vmul.f32 %v550_v45, %v189_v49 }
 0x1bd   :  { %v194_v53 = vsel %vm193_vm7, %v550_v45, %v190_v50  ;;  %v361_v50 = vld [vmem:[%s859_s14] sm:$0xff] }
 0x1be   :  { %v195_v54 = vmul.f32 %v194_v53, %v181_v51  ;;  %389 = vmatpush.msrb.mxu1 %v361_v50 }
 0x1c0   :  { %v199_v56 = vmul.f32 %v536_v52, %v195_v54 }
 0x1c2   :  { %v203_v57 = vadd.f32 %v537_v55, %v199_v56 }
 0x1c4   :  { %v205_v58 = vmul.f32 1.442695, %v203_v57  ;;  %vm204_vm8 = vcmp.gt.f32.partialorder %v203_v57, 0.0 }
 0x1c6   :  { %551 = vpow2.f32 %v205_v58 }
 0x1c7   :  { %553 = vrcp.f32 %v599_v4 }
 0x1cc   :  { %v552_v59 = vpop.eup %551 }
 0x1cd   :  { %v516_v60 = vadd.f32 -1.0, %v552_v59  ;;  %v554_v5 = vpop.eup %553 }
 0x1ce   :  { %v251_v6 = vmul.f32 32.0, %v554_v5  ;;  %vm255_vm10 = vweird.f32 %v554_v5 }
 0x1cf   :  { %v208_v61 = vsel %vm204_vm8, %v203_v57, %v516_v60 }
 0x1d0   :  { %517 = vmatmul.msk.f32.vlgmr.msra.gmra.mxu2 %vm164_vm3, %v208_v61  ;;  %v252_v7 = vsub.f32 1.0, %v251_v6 }
 0x1d2   :  { %v253_v8 = vmul.f32 %v554_v5, %v252_v7 }
 0x1d4   :  { %v254_v9 = vadd.f32 %v554_v5, %v253_v8 }
 0x1d6   :  { %v781_v13 = vsel %vm255_vm10, %v554_v5, %v254_v9  ;;  %v544_v9 = vld [vmem:[%s860_s15] ss:$0 sm:$0xff]  ;;  %vm484_vm10 = vcmask 57344  }
 0x253   :  { %v243_v63 = vpop.f32.mrf.mxu2 }
 0x254   :  { %v244_v0 = vadd.f32 %v538_v62, %v243_v63  ;;  %v542_v63 = vld [vmem:[%s857_s12] ss:$0 sm:$0xff] }
 0x256   :  { %v247_v1 = vsel %vm246_vm9, %v244_v0, 0.0  ;;  %v258_v2 = vmul.f32 %v244_v0, %v244_v0 }
 0x257   :  { %248 = vadd.xlane.f32.xlu1 %v247_v1 }
 0x258   :  { %v259_v3 = vsel %vm246_vm9, %v258_v2, 0.0  ;;  %v543_v2 = vld [vmem:[%s858_s13] ss:$0 sm:$0xff] }
 0x25f   :  { %260 = vadd.xlane.f32.xlu1 %v259_v3 }
 0x2ca   :  { %v249_v10 = vpop.xlane.xlu1 %248 }
 0x2cb   :  { %v257_v16 = vmul.f32 %v781_v13, %v249_v10 }
 0x2cd   :  { %v264_v18 = vmul.f32 %v257_v16, %v257_v16  ;;  %v263_v28 = vsub.f32 %v244_v0, %v257_v16 }
 0x2d2   :  { %v261_v17 = vpop.xlane.xlu1 %260 }
 0x2d3   :  { %v262_v19 = vmul.f32 %v261_v17, %v781_v13 }
 0x2d5   :  { %v265_v20 = vsub.f32 %v262_v19, %v264_v18 }
 0x2d7   :  { %v266_v21 = vadd.f32 1e-05, %v265_v20 }
 0x2d9   :  { %555 = vrsqrt.f32 %v266_v21  ;;  %vm273_vm12 = vweird.f32 %v266_v21 }
 0x2df   :  { %v556_v22 = vpop.eup %555 }
 0x2e0   :  { %v268_v23 = vmul.f32 %v556_v22, %v266_v21  ;;  %vm274_vm11 = vweird.f32 %v556_v22 }
 0x2e1   :  { %vm275_vm13 = vmor %vm273_vm12, %vm274_vm11 }
 0x2e2   :  { %v269_v24 = vmul.f32 %v556_v22, %v268_v23 }
 0x2e4   :  { %v270_v25 = vmul.f32 0.5, %v269_v24 }
 0x2e6   :  { %v271_v26 = vsub.f32 1.5, %v270_v25 }
 0x2e8   :  { %v272_v27 = vmul.f32 %v556_v22, %v271_v26  ;;  %v433_v26 = vld [vmem:[#allocation3] sm:$0x1] }
 0x2ea   :  { %v276_v30 = vsel %vm275_vm13, %v556_v22, %v272_v27  ;;  %v600_v27 = vmov 0  }
 0x2eb   :  { %v277_v31 = vmul.f32 %v276_v30, %v263_v28  ;;  %533 = vset.pattern.permute.xlu2 %v600_v27  ;;  %534 = vset.pattern.permute.xlu0 %v600_v27 }
 0x2ed   :  { %v281_v33 = vmul.f32 %v539_v29, %v277_v31 }
 0x2ef   :  { %v285_v34 = vadd.f32 %v540_v32, %v281_v33 }
 0x2f1   :  { %v287_v35 = vmul.f32 1.442695, %v285_v34  ;;  %vm286_vm14 = vcmp.gt.f32.partialorder %v285_v34, 0.0 }
 0x2f3   :  { %557 = vpow2.f32 %v287_v35 }
 0x2f9   :  { %v558_v36 = vpop.eup %557 }
 0x2fa   :  { %v518_v37 = vadd.f32 -1.0, %v558_v36 }
 0x2fc   :  { %v290_v38 = vsel %vm286_vm14, %v285_v34, %v518_v37  ;;  %v546_v34 = vld [vmem:[%s862_s17] ss:$0 sm:$0xff] }
 0x2fd   :  { %519 = vmatmul.msk.f32.vlgmr.msra.gmra.mxu3 %vm246_vm9, %v290_v38 }
 0x380   :  { %v321_v40 = vpop.f32.mrf.mxu3 }
 0x381   :  { %v322_v41 = vadd.f32 %v541_v39, %v321_v40 }
 0x383   :  { %v324_v42 = vsel %vm246_vm9, %v322_v41, 0.0  ;;  %v328_v43 = vmul.f32 %v322_v41, %v322_v41 }
 0x384   :  { %325 = vadd.xlane.f32.xlu2 %v324_v42  ;;  %v432_v42 = vld [vmem:[%s863_s18] sm:$0x1] }
 0x385   :  { %v329_v44 = vsel %vm246_vm9, %v328_v43, 0.0 }
 0x38c   :  { %330 = vadd.xlane.f32.xlu2 %v329_v44 }
 0x3a4   :  { %436 = vperm.xlu2 %533, %v433_v26  }
 0x3f7   :  { %v326_v45 = vpop.xlane.xlu2 %325 }
 0x3f8   :  { %v327_v49 = vmul.f32 %v326_v45, %v781_v13 }
 0x3fa   :  { %v334_v52 = vmul.f32 %v327_v49, %v327_v49  ;;  %v333_v62 = vsub.f32 %v322_v41, %v327_v49 }
 0x3ff   :  { %v331_v51 = vpop.xlane.xlu2 %330 }
 0x400   :  { %v332_v53 = vmul.f32 %v331_v51, %v781_v13 }
 0x402   :  { %v335_v54 = vsub.f32 %v332_v53, %v334_v52 }
 0x404   :  { %v336_v55 = vadd.f32 1e-05, %v335_v54 }
 0x406   :  { %559 = vrsqrt.f32 %v336_v55  ;;  %vm343_vm0 = vweird.f32 %v336_v55 }
 0x407   :  { %v437_v43 = vpop.permute.xlu2 %436 }
 0x408   :  { %v439_v44 = vperm.slane %v437_v43, 0 }
 0x40c   :  { %v560_v56 = vpop.eup %559 }
 0x40d   :  { %v338_v57 = vmul.f32 %v560_v56, %v336_v55  ;;  %vm344_vm15 = vweird.f32 %v560_v56 }
 0x40e   :  { %vm345_vm1 = vmor %vm343_vm0, %vm344_vm15 }
 0x40f   :  { %v339_v58 = vmul.f32 %v560_v56, %v338_v57 }
 0x411   :  { %v340_v59 = vmul.f32 0.5, %v339_v58 }
 0x413   :  { %v341_v60 = vsub.f32 1.5, %v340_v59 }
 0x415   :  { %v342_v61 = vmul.f32 %v560_v56, %v341_v60 }
 0x417   :  { %v346_v0 = vsel %vm345_vm1, %v560_v56, %v342_v61 }
 0x418   :  { %v347_v1 = vmul.f32 %v346_v0, %v333_v62 }
 0x41a   :  { %v351_v3 = vmul.f32 %v542_v63, %v347_v1 }
 0x41c   :  { %v355_v4 = vadd.f32 %v543_v2, %v351_v3 }
 0x41e   :  { %v357_v5 = vmul.f32 1.442695, %v355_v4  ;;  %vm356_vm2 = vcmp.gt.f32.partialorder %v355_v4, 0.0 }
 0x420   :  { %561 = vpow2.f32 %v357_v5 }
 0x426   :  { %v562_v6 = vpop.eup %561 }
 0x427   :  { %v520_v7 = vadd.f32 -1.0, %v562_v6 }
 0x429   :  { %v360_v8 = vsel %vm356_vm2, %v355_v4, %v520_v7 }
 0x42a   :  { %521 = vmatmul.msk.f32.vlgmr.msrb.gmra.mxu1 %vm246_vm9, %v360_v8 }
 0x4a7   :  { %v391_v10 = vpop.f32.mrf.mxu1 }
 0x4a8   :  { %v392_v11 = vadd.f32 %v544_v9, %v391_v10 }
 0x4aa   :  { %v394_v12 = vsel %vm246_vm9, %v392_v11, 0.0  ;;  %v398_v14 = vmul.f32 %v392_v11, %v392_v11 }
 0x4ab   :  { %395 = vadd.xlane.f32.xlu0 %v394_v12 }
 0x4ac   :  { %v399_v15 = vsel %vm246_vm9, %v398_v14, 0.0 }
 0x4ad   :  { %400 = vadd.xlane.f32.xlu1 %v399_v15 }
 0x51e   :  { %v396_v16 = vpop.xlane.xlu0 %395 }
 0x51f   :  { %v397_v17 = vmul.f32 %v396_v16, %v781_v13 }
 0x520   :  { %v401_v18 = vpop.xlane.xlu1 %400 }
 0x521   :  { %v404_v19 = vmul.f32 %v397_v17, %v397_v17  ;;  %v402_v20 = vmul.f32 %v401_v18, %v781_v13  ;;  %v403_v31 = vsub.f32 %v392_v11, %v397_v17  ;;  %v545_v13 = vld [vmem:[%s861_s16] ss:$0 sm:$0xff]  ;;  %s601_s16 = smov [#allocation4]  }
 0x522   :  { %s491_s17 = sshll.u32 %s601_s16, 4  ;;  %s492_s17 = int_to_ptr.vmem [resolvable:$true] %s491_s17 }
 0x523   :  { %v405_v21 = vsub.f32 %v402_v20, %v404_v19 }
 0x525   :  { %v406_v22 = vadd.f32 1e-05, %v405_v21 }
 0x527   :  { %563 = vrsqrt.f32 %v406_v22  ;;  %vm413_vm4 = vweird.f32 %v406_v22 }
 0x52d   :  { %v564_v23 = vpop.eup %563 }
 0x52e   :  { %v408_v24 = vmul.f32 %v564_v23, %v406_v22  ;;  %vm414_vm3 = vweird.f32 %v564_v23 }
 0x52f   :  { %vm415_vm5 = vmor %vm413_vm4, %vm414_vm3 }
 0x530   :  { %v409_v25 = vmul.f32 %v564_v23, %v408_v24 }
 0x532   :  { %v410_v28 = vmul.f32 0.5, %v409_v25 }
 0x534   :  { %v411_v29 = vsub.f32 1.5, %v410_v28 }
 0x536   :  { %v412_v30 = vmul.f32 %v564_v23, %v411_v29 }
 0x538   :  { %v416_v32 = vsel %vm415_vm5, %v564_v23, %v412_v30 }
 0x539   :  { %v417_v33 = vmul.f32 %v416_v32, %v403_v31 }
 0x53b   :  { %v421_v35 = vmul.f32 %v545_v13, %v417_v33 }
 0x53d   :  { %v425_v36 = vadd.f32 %v546_v34, %v421_v35 }
 0x53f   :  { %v427_v37 = vmul.f32 1.442695, %v425_v36  ;;  %vm426_vm6 = vcmp.gt.f32.partialorder %v425_v36, 0.0 }
 0x541   :  { %565 = vpow2.f32 %v427_v37 }
 0x547   :  { %v566_v38 = vpop.eup %565 }
 0x548   :  { %v522_v39 = vadd.f32 -1.0, %v566_v38 }
 0x54a   :  { %v430_v40 = vsel %vm426_vm6, %v425_v36, %v522_v39 }
 0x54b   :  { %v431_v41 = vadd.f32 %v430_v40, %v360_v8 }
 0x54d   :  { %523 = vmatpush.xpose.msk.msrb.mxu3 %vm246_vm9, %v431_v41 }
 0x550   :  { %524 = vmatmul.msk.f32.vlgmr.msrb.gmra.mxu3 %vm246_vm9, %v432_v42 }
 0x5d3   :  { %v463_v45 = vpop.f32.mrf.mxu3 }
 0x5d4   :  { %v464_v46 = vadd.f32 %v463_v45, %v439_v44 }
 0x5d6   :  { %v466_v47 = vsub.f32 0.0, %v464_v46 }
 0x5d8   :  { %v467_v48 = vmul.f32 1.442695, %v466_v47 }
 0x5da   :  { %567 = vpow2.f32 %v467_v48 }
 0x5e0   :  { %v568_v49 = vpop.eup %567 }
 0x5e1   :  { %v469_v50 = vadd.f32 1.0, %v568_v49 }
 0x5e3   :  { %569 = vrcp.f32 %v469_v50  ;;  %v481_v54 = vand.u32 2147483648, %v469_v50  ;;  %v479_v56 = vand.u32 2147483647, %v469_v50  ;;  %vm475_vm8 = vweird.f32 %v469_v50 }
 0x5e5   :  { %v482_v58 = vor.u32 1.1754944e-38, %v481_v54  ;;  %vm480_vm11 = vcmp.eq.f32.partialorder %v479_v56, 8.507059e+37 }
 0x5e9   :  { %v570_v51 = vpop.eup %569 }
 0x5ea   :  { %v471_v52 = vmul.f32 %v570_v51, %v469_v50  ;;  %vm476_vm7 = vweird.f32 %v570_v51 }
 0x5eb   :  { %vm477_vm9 = vmor %vm475_vm8, %vm476_vm7 }
 0x5ec   :  { %v472_v53 = vsub.f32 1.0, %v471_v52 }
 0x5ee   :  { %v473_v55 = vmul.f32 %v570_v51, %v472_v53 }
 0x5f0   :  { %v474_v57 = vadd.f32 %v570_v51, %v473_v55 }
 0x5f2   :  { %v478_v59 = vsel %vm477_vm9, %v570_v51, %v474_v57 }
 0x5f3   :  { %v483_v60 = vsel %vm480_vm11, %v482_v58, %v478_v59 }
 0x5f4   :  { %485 = vst.msk [vmem:[#allocation4] sm:$0x1] %vm484_vm10, %v483_v60 }
 0x5f5   :  { %496 = dma.vmem_to_hbm [thread:$0]  %s492_s17, 16, %s494_s10, [#allocation5]  }
 0x5f6   :  { %595 = dma.done.wait [#allocation5], 16  }
 0x5f7   :  { %596 = vsyncadd [#allocation5], 4294967280 }
 0x5f8   :  { %501 = vsyncpa [#allocation5], 1 }

</bundles_post_ra>
